<compile_context>
chip_gen: v7x
topology: tpu7x:2x2x1
jax: 0.10.0
libtpu: 0.0.40
codegen_flags: <defaults>
</compile_context>

<pallas_src>
import functools

import jax
import jax.numpy as jnp
from jax.experimental import pallas as pl
from jax.experimental.pallas import tpu as pltpu

LANE = 128
SUB = 8


def _round_up(x, m):
    return ((x + m - 1) // m) * m


def _sigmoid(x):
    # logistic via tanh -> runs on the EUP bundle slot instead of a VPU
    # Newton-iteration divide chain.
    return 0.5 * jnp.tanh(0.5 * x) + 0.5


# ---------------------------------------------------------------------------
# Stage 1: gx = relu(x @ W_in^T + b_in) @ W_ih^T + (b_ih + b_hh)
#   x rows are the flattened (t, b) index; everything lane-dense / padded.
# ---------------------------------------------------------------------------
def _pregate_kernel(x_ref, win_ref, bin_ref, wih_ref, bsum_ref, gx_ref):
    x = x_ref[...]                                                      # (tr, nxp) storage dtype
    h0 = jnp.dot(x, win_ref[...], preferred_element_type=jnp.float32)  # (tr, Hp) f32
    h0 = jnp.maximum(h0 + bin_ref[...], 0.0)                            # ReLU in f32
    gx = jnp.dot(h0.astype(wih_ref.dtype), wih_ref[...],
                 preferred_element_type=jnp.float32)                    # (tr, 4Hp) f32
    gx_ref[...] = (gx + bsum_ref[...]).astype(gx_ref.dtype)


# ---------------------------------------------------------------------------
# Stage 2: time-blocked sequential LSTM recurrence + fused linearOut
#   gates layout (cuDNN / PyTorch): [i | f | g | o], each Hp lanes wide.
#   One grid step = tb timesteps, fully unrolled (static slice offsets);
#   h/c carried in f32 VMEM scratch across grid steps.
# ---------------------------------------------------------------------------
def _lstm_seq_kernel(gx_ref, whh_ref, wout_ref, bout_ref, out_ref,
                     h_scr, c_scr, *, hp, tb, bp):
    tblk = pl.program_id(0)

    @pl.when(tblk == 0)
    def _():
        h_scr[...] = jnp.zeros_like(h_scr)
        c_scr[...] = jnp.zeros_like(c_scr)

    whh = whh_ref[...]                                                  # (Hp, 4Hp) storage dtype
    wout = wout_ref[...]                                                # (Hp, nyp) storage dtype
    bout = bout_ref[...]                                                # (1, nyp)  f32
    h = h_scr[...]                                                      # (Bp, Hp)  f32
    c = c_scr[...]                                                      # (Bp, Hp)  f32

    for s in range(tb):  # static Python unroll -> static slice offsets
        gx = gx_ref[pl.ds(s * bp, bp), :].astype(jnp.float32)          # (Bp, 4Hp) f32
        gates = gx + jnp.dot(h.astype(whh.dtype), whh,
                             preferred_element_type=jnp.float32)
        i_g = _sigmoid(gates[:, 0 * hp:1 * hp])
        f_g = _sigmoid(gates[:, 1 * hp:2 * hp])
        g_g = jnp.tanh(gates[:, 2 * hp:3 * hp])
        o_g = _sigmoid(gates[:, 3 * hp:4 * hp])
        c = f_g * c + i_g * g_g
        h = o_g * jnp.tanh(c)
        y = jnp.dot(h.astype(wout.dtype), wout,
                    preferred_element_type=jnp.float32) + bout
        out_ref[s] = y.astype(out_ref.dtype)                            # (Bp, nyp)

    h_scr[...] = h
    c_scr[...] = c


# ---------------------------------------------------------------------------
# Wrapper: layout plumbing (transpose / pad / dtype) + two pallas_calls
# ---------------------------------------------------------------------------
def _pad_gates_t(w, H, Hp, in_dim, in_dim_p):
    """(4H, in_dim) -> transposed per-gate-padded (in_dim_p, 4*Hp)."""
    wt = w.T                                                            # (in_dim, 4H)
    cols = []
    for g in range(4):
        blk = wt[:, g * H:(g + 1) * H]
        blk = jnp.pad(blk, ((0, in_dim_p - in_dim), (0, Hp - H)))
        cols.append(blk)
    return jnp.concatenate(cols, axis=1)


def _pad_gate_bias(b, H, Hp):
    parts = [jnp.pad(b[g * H:(g + 1) * H], (0, Hp - H)) for g in range(4)]
    return jnp.concatenate(parts).reshape(1, 4 * Hp)


def cudnn_lstm_model_forward(x, params, *, storage_dtype=jnp.bfloat16,
                             row_tile=None, time_block=None):
    """Forward of CudnnLstmModel (inference path, no dropout).

    x: (T, B, nx) time-major; params = (w_in, b_in, w_ih, w_hh, b_ih, b_hh,
    w_out, b_out) with PyTorch shapes.
    """
    (w_in, b_in, w_ih, w_hh, b_ih, b_hh, w_out, b_out) = params
    T, B, nx = x.shape
    H = w_hh.shape[1]
    ny = w_out.shape[0]
    f32 = jnp.float32
    sdt = storage_dtype
    item = jnp.dtype(sdt).itemsize

    nxp = _round_up(nx, LANE)
    Hp = _round_up(H, LANE)
    nyp = _round_up(ny, LANE)
    Bp = _round_up(B, SUB)

    # --- time blocking for the recurrence -----------------------------------
    if time_block is None:
        time_block = 16
    TB = max(1, min(int(time_block), T))
    T_pad = _round_up(T, TB)
    n_tblk = T_pad // TB

    # --- lane-dense, zero-padded weight layouts (built once in the wrapper) --
    # Zero padding is self-consistent: padded gate lanes get gates==0 ->
    # i=f=o=0.5, g=0 -> padded h/c lanes stay exactly 0 and never leak.
    win_t = jnp.pad(w_in.T.astype(f32), ((0, nxp - nx), (0, Hp - H))).astype(sdt)
    bin_p = jnp.pad(b_in.astype(f32), (0, Hp - H)).reshape(1, Hp)
    wih_t = _pad_gates_t(w_ih.astype(f32), H, Hp, H, Hp).astype(sdt)    # (Hp, 4Hp)
    whh_t = _pad_gates_t(w_hh.astype(f32), H, Hp, H, Hp).astype(sdt)    # (Hp, 4Hp)
    bsum = _pad_gate_bias((b_ih + b_hh).astype(f32), H, Hp)             # (1, 4Hp) f32
    wout_t = jnp.pad(w_out.T.astype(f32), ((0, Hp - H), (0, nyp - ny))).astype(sdt)
    bout_p = jnp.pad(b_out.astype(f32), (0, nyp - ny)).reshape(1, nyp)

    # --- stage 1: row-tiled parallel grid over flattened (T_pad * Bp) rows ---
    rows_t = T_pad * Bp
    if row_tile is None:
        row_tile = 512 if 4 * Hp <= 2048 else 256
    tr = min(int(row_tile), _round_up(rows_t, SUB))
    rows_p = _round_up(rows_t, tr)

    xf = jnp.pad(x.astype(f32),
                 ((0, T_pad - T), (0, Bp - B), (0, nxp - nx))).astype(sdt)
    xf = xf.reshape(rows_t, nxp)
    if rows_p > rows_t:
        xf = jnp.pad(xf, ((0, rows_p - rows_t), (0, 0)))

    stage1_bytes = (2 * item * (tr * nxp + tr * 4 * Hp              # x / gx blocks (dbl buf)
                                + nxp * Hp + Hp * 4 * Hp)           # resident weights
                    + 8 * (Hp + 4 * Hp))                            # f32 biases
    stage1_vmem = int(min(128 * 1024 * 1024,
                          max(32 * 1024 * 1024, 2 * stage1_bytes)))

    gx = pl.pallas_call(
        _pregate_kernel,
        out_shape=jax.ShapeDtypeStruct((rows_p, 4 * Hp), sdt),
        grid_spec=pltpu.PrefetchScalarGridSpec(
            num_scalar_prefetch=0,
            grid=(rows_p // tr,),
            in_specs=[
                pl.BlockSpec((tr, nxp), lambda i: (i, 0)),
                pl.BlockSpec((nxp, Hp), lambda i: (0, 0)),       # VMEM-resident
                pl.BlockSpec((1, Hp), lambda i: (0, 0)),
                pl.BlockSpec((Hp, 4 * Hp), lambda i: (0, 0)),    # VMEM-resident
                pl.BlockSpec((1, 4 * Hp), lambda i: (0, 0)),
            ],
            out_specs=pl.BlockSpec((tr, 4 * Hp), lambda i: (i, 0)),
        ),
        compiler_params=pltpu.CompilerParams(
            dimension_semantics=("parallel",),
            vmem_limit_bytes=stage1_vmem),
    )(xf, win_t, bin_p, wih_t, bsum)

    # --- stage 2: time-blocked sequential recurrence + fused linearOut ------
    # gx is consumed directly in its flat (rows_p, 4Hp) layout: block t covers
    # rows [t*TB*Bp, (t+1)*TB*Bp) == timesteps [t*TB, (t+1)*TB). No repack.
    stage2_bytes = (2 * item * (TB * Bp * 4 * Hp                    # gx block (dbl buf)
                                + Hp * 4 * Hp + Hp * nyp)           # resident weights
                    + 2 * 4 * (TB * Bp * nyp)                       # out block (dbl buf)
                    + 2 * 4 * Bp * Hp                               # h/c scratch
                    + 8 * nyp)
    stage2_vmem = int(min(128 * 1024 * 1024,
                          max(32 * 1024 * 1024, 2 * stage2_bytes)))

    step_kernel = functools.partial(_lstm_seq_kernel, hp=Hp, tb=TB, bp=Bp)
    out_p = pl.pallas_call(
        step_kernel,
        out_shape=jax.ShapeDtypeStruct((T_pad, Bp, nyp), f32),
        grid_spec=pltpu.PrefetchScalarGridSpec(
            num_scalar_prefetch=0,
            grid=(n_tblk,),
            in_specs=[
                pl.BlockSpec((TB * Bp, 4 * Hp), lambda t: (t, 0)),
                pl.BlockSpec((Hp, 4 * Hp), lambda t: (0, 0)),    # VMEM-resident
                pl.BlockSpec((Hp, nyp), lambda t: (0, 0)),       # VMEM-resident
                pl.BlockSpec((1, nyp), lambda t: (0, 0)),
            ],
            out_specs=pl.BlockSpec((TB, Bp, nyp), lambda t: (t, 0, 0)),
            scratch_shapes=[
                pltpu.VMEM((Bp, Hp), f32),   # h carry (f32)
                pltpu.VMEM((Bp, Hp), f32),   # c carry (f32)
            ],
        ),
        compiler_params=pltpu.CompilerParams(
            dimension_semantics=("arbitrary",),
            vmem_limit_bytes=stage2_vmem),
    )(gx, whh_t, wout_t, bout_p)

    return out_p[:T, :B, :ny].astype(x.dtype)


# ---------------------------------------------------------------------------
# Pure-JAX reference (same math, lax.scan recurrence)
# ---------------------------------------------------------------------------
def _reference(x, params):
    w_in, b_in, w_ih, w_hh, b_ih, b_hh, w_out, b_out = params
    x0 = jax.nn.relu(jnp.einsum("tbi,hi->tbh", x, w_in) + b_in)
    T, B, _ = x.shape
    H = w_hh.shape[1]

    def step(carry, xt):
        h, c = carry
        gates = xt @ w_ih.T + b_ih + h @ w_hh.T + b_hh
        i, f, g, o = jnp.split(gates, 4, axis=-1)
        i = jax.nn.sigmoid(i)
        f = jax.nn.sigmoid(f)
        g = jnp.tanh(g)
        o = jax.nn.sigmoid(o)
        c = f * c + i * g
        h = o * jnp.tanh(c)
        return (h, c), h

    h0 = jnp.zeros((B, H), x.dtype)
    c0 = jnp.zeros((B, H), x.dtype)
    _, hs = jax.lax.scan(step, (h0, c0), x0)
    return hs @ w_out.T + b_out


if __name__ == "__main__":
    # CudnnLstmModel(nx, ny, hiddenSize); cuDNN LSTM input is time-major (T, B, nx)
    nx, ny, hiddenSize = 4, 2, 32
    T, B = 8, 2

    key = jax.random.PRNGKey(0)
    ks = jax.random.split(key, 9)
    stdv_in = 1.0 / (nx ** 0.5)
    stdv_h = 1.0 / (hiddenSize ** 0.5)
    w_in = jax.random.uniform(ks[0], (hiddenSize, nx), jnp.float32, -stdv_in, stdv_in)
    b_in = jax.random.uniform(ks[1], (hiddenSize,), jnp.float32, -stdv_in, stdv_in)
    w_ih = jax.random.uniform(ks[2], (4 * hiddenSize, hiddenSize), jnp.float32, -stdv_h, stdv_h)
    w_hh = jax.random.uniform(ks[3], (4 * hiddenSize, hiddenSize), jnp.float32, -stdv_h, stdv_h)
    b_ih = jax.random.uniform(ks[4], (4 * hiddenSize,), jnp.float32, -stdv_h, stdv_h)
    b_hh = jax.random.uniform(ks[5], (4 * hiddenSize,), jnp.float32, -stdv_h, stdv_h)
    w_out = jax.random.uniform(ks[6], (ny, hiddenSize), jnp.float32, -stdv_h, stdv_h)
    b_out = jax.random.uniform(ks[7], (ny,), jnp.float32, -stdv_h, stdv_h)
    x = jax.random.normal(ks[8], (T, B, nx), jnp.float32)

    params = (w_in, b_in, w_ih, w_hh, b_ih, b_hh, w_out, b_out)
    ref = _reference(x, params)

    # f32 storage path: tight tolerance vs reference.
    out32 = cudnn_lstm_model_forward(x, params, storage_dtype=jnp.float32)
    out32 = jax.block_until_ready(out32)
    assert out32.shape == ref.shape == (T, B, ny)
    err32 = float(jnp.max(jnp.abs(out32 - ref)))
    assert jnp.allclose(out32, ref, atol=1e-4, rtol=1e-4), \
        f"f32 path mismatch vs reference LSTM, max |err|={err32}"

    # bf16 storage path (default, perf config): looser tolerance.
    out16 = cudnn_lstm_model_forward(x, params)  # storage_dtype=bfloat16
    out16 = jax.block_until_ready(out16)
    assert out16.shape == (T, B, ny)
    err16 = float(jnp.max(jnp.abs(out16 - ref)))
    assert jnp.allclose(out16, ref, atol=3e-2, rtol=3e-2), \
        f"bf16 path mismatch vs reference LSTM, max |err|={err16}"

    print("KERNEL_OK")
</pallas_src>

<mosaic_0001>
module attributes {stable_mosaic.version = 11 : i64} {
  func.func @_pregate_kernel(%arg0: i32, %arg1: memref<64x128xf32, #tpu.memory_space<vmem>>, %arg2: memref<128x128xf32, #tpu.memory_space<vmem>>, %arg3: memref<1x128xf32, #tpu.memory_space<vmem>>, %arg4: memref<128x512xf32, #tpu.memory_space<vmem>>, %arg5: memref<1x512xf32, #tpu.memory_space<vmem>>, %arg6: memref<64x512xf32, #tpu.memory_space<vmem>>) attributes {dimension_semantics = [#tpu.dimension_semantics<parallel>], iteration_bounds = array<i64: 1>, scalar_prefetch = 0 : i64, scratch_operands = 0 : i64, tpu.core_type = #tpu.core_type<tc>, window_params = [{transform_indices = @transform_0, window_bounds = array<i64: 64, 128>}, {pipeline_mode = #tpu.pipeline_mode<synchronous>, transform_indices = @transform_1, window_bounds = array<i64: 128, 128>}, {pipeline_mode = #tpu.pipeline_mode<synchronous>, transform_indices = @transform_2, window_bounds = array<i64: 1, 128>}, {pipeline_mode = #tpu.pipeline_mode<synchronous>, transform_indices = @transform_3, window_bounds = array<i64: 128, 512>}, {pipeline_mode = #tpu.pipeline_mode<synchronous>, transform_indices = @transform_4, window_bounds = array<i64: 1, 512>}, {transform_indices = @transform_5, window_bounds = array<i64: 64, 512>}]} {
    %c0 = arith.constant 0 : index
    %c0_0 = arith.constant 0 : index
    %0 = vector.load %arg1[%c0, %c0_0] : memref<64x128xf32, #tpu.memory_space<vmem>>, vector<64x128xf32>
    %c0_1 = arith.constant 0 : index
    %c0_2 = arith.constant 0 : index
    %1 = vector.load %arg2[%c0_1, %c0_2] : memref<128x128xf32, #tpu.memory_space<vmem>>, vector<128x128xf32>
    %cst = arith.constant dense<0.000000e+00> : vector<64x128xf32>
    %2 = tpu.matmul %0, %1, %cst {dimension_numbers = #tpu.dot_dimension_numbers<[1], [0], [0], [1], [0, 0, 1, 1], [], []>} : vector<64x128xf32>, vector<128x128xf32>, vector<64x128xf32> -> vector<64x128xf32>
    %c0_3 = arith.constant 0 : index
    %c0_4 = arith.constant 0 : index
    %3 = vector.load %arg3[%c0_3, %c0_4] : memref<1x128xf32, #tpu.memory_space<vmem>>, vector<1x128xf32>
    %4 = vector.broadcast %3 : vector<1x128xf32> to vector<64x128xf32>
    %5 = arith.addf %2, %4 : vector<64x128xf32>
    %cst_5 = arith.constant 0.000000e+00 : f32
    %6 = vector.broadcast %cst_5 : f32 to vector<64x128xf32>
    %7 = arith.maximumf %5, %6 : vector<64x128xf32>
    %c0_6 = arith.constant 0 : index
    %c0_7 = arith.constant 0 : index
    %8 = vector.load %arg4[%c0_6, %c0_7] : memref<128x512xf32, #tpu.memory_space<vmem>>, vector<128x512xf32>
    %cst_8 = arith.constant dense<0.000000e+00> : vector<64x512xf32>
    %9 = tpu.matmul %7, %8, %cst_8 {dimension_numbers = #tpu.dot_dimension_numbers<[1], [0], [0], [1], [0, 0, 1, 1], [], []>} : vector<64x128xf32>, vector<128x512xf32>, vector<64x512xf32> -> vector<64x512xf32>
    %c0_9 = arith.constant 0 : index
    %c0_10 = arith.constant 0 : index
    %10 = vector.load %arg5[%c0_9, %c0_10] : memref<1x512xf32, #tpu.memory_space<vmem>>, vector<1x512xf32>
    %11 = vector.broadcast %10 : vector<1x512xf32> to vector<64x512xf32>
    %12 = arith.addf %9, %11 : vector<64x512xf32>
    %c0_11 = arith.constant 0 : index
    %c0_12 = arith.constant 0 : index
    %13 = vector.load %arg6[%c0_11, %c0_12] : memref<64x512xf32, #tpu.memory_space<vmem>>, vector<64x512xf32>
    tpu.vector_store %arg6[%c0_11, %c0_12], %12 {strides = array<i32>} : memref<64x512xf32, #tpu.memory_space<vmem>>, vector<64x512xf32>,
    return
  }
  func.func @transform_0(%arg0: i32) -> (i32, i32) {
    %c0_i32 = arith.constant 0 : i32
    %c0_i32_0 = arith.constant 0 : i32
    return %arg0, %c0_i32 : i32, i32
  }
  func.func @transform_1(%arg0: i32) -> (i32, i32) {
    %c0_i32 = arith.constant 0 : i32
    %c0_i32_0 = arith.constant 0 : i32
    %c0_i32_1 = arith.constant 0 : i32
    return %c0_i32, %c0_i32_0 : i32, i32
  }
  func.func @transform_2(%arg0: i32) -> (i32, i32) {
    %c0_i32 = arith.constant 0 : i32
    %c0_i32_0 = arith.constant 0 : i32
    %c0_i32_1 = arith.constant 0 : i32
    return %c0_i32, %c0_i32_0 : i32, i32
  }
  func.func @transform_3(%arg0: i32) -> (i32, i32) {
    %c0_i32 = arith.constant 0 : i32
    %c0_i32_0 = arith.constant 0 : i32
    %c0_i32_1 = arith.constant 0 : i32
    return %c0_i32, %c0_i32_0 : i32, i32
  }
  func.func @transform_4(%arg0: i32) -> (i32, i32) {
    %c0_i32 = arith.constant 0 : i32
    %c0_i32_0 = arith.constant 0 : i32
    %c0_i32_1 = arith.constant 0 : i32
    return %c0_i32, %c0_i32_0 : i32, i32
  }
  func.func @transform_5(%arg0: i32) -> (i32, i32) {
    %c0_i32 = arith.constant 0 : i32
    %c0_i32_0 = arith.constant 0 : i32
    return %arg0, %c0_i32 : i32, i32
  }
}

</mosaic_0001>

<bundles_post_ra>
// kernel: tpu_custom_call.1
= control target key start
LH: loop header
LB: loop body
LE: loop exit
PB: predicated region body
PF: predicated region fallthrough
CT: control target
= control target key end

     0   :  { %10 = vsyncpa [#allocation3], 0  ;;  %s1078_s0 = inlined_call_operand.hbm [shape: f32[64,128], index: 0, kind: input, shape index: {}]   ;;  %s1079_s1 = inlined_call_operand.hbm [shape: f32[128,128], index: 1, kind: input, shape index: {}]   ;;  %s1080_s2 = inlined_call_operand.vmem [shape: f32[1,128], index: 2, kind: input, shape index: {}]   ;;  %s1081_s3 = inlined_call_operand.hbm [shape: f32[128,512], index: 3, kind: input, shape index: {}]   ;;  %s1082_s4 = inlined_call_operand.vmem [shape: f32[1,512], index: 4, kind: input, shape index: {}]   ;;  %s1083_s5 = inlined_call_operand.hbm [shape: f32[64,512], index: 5, kind: output, shape index: {}]  }
   0x1   :  { %11 = vsyncpa [#allocation6], 0 }
   0x2   :  { %12 = vsyncpa [#allocation4], 0  ;;  %s852_s18 = smov [#allocation5]   ;;  %s853_s20 = smov [#allocation2]  }
   0x3   :  { %s30_s19 = sshll.u32 %s852_s18, 4  ;;  %s18_s21 = sshll.u32 %s853_s20, 4  ;;  %s31_s19 = int_to_ptr.vmem [resolvable:$true] %s30_s19  ;;  %s891_s21 = int_to_ptr.vmem [resolvable:$true] %s18_s21 }
   0x4   :  { %s758_s24 = scalar_lea.hbm %s1079_s1, 2048 }
   0x5   :  { %p759_p0 = scmp.ne.s32.totalorder %s1079_s1, %s758_s24  ;;  %p762_p1 = scmp.lt.u32.totalorder %s758_s24, %s1079_s1 }
   0x7   :  { %p764_p2 = pnand %p762_p1, %p759_p0 }
   0x9   :  { %767 = shalt.err (!%p764_p2)
}
   0xa   :  { %s768_s29 = scalar_lea.vmem %s31_s19, 2048  ;;  %p773_p4 = scmp.lt.s32.totalorder %s31_s19, %s31_s19 }
   0xb   :  { %p769_p3 = scmp.ne.s32.totalorder %s31_s19, %s768_s29  ;;  %p774_p5 = scmp.lt.s32.totalorder %s768_s29, %s768_s29 }
   0xd   :  { %p775_p6 = por %p774_p5, %p773_p4 }
   0xf   :  { %p776_p7 = pnand %p775_p6, %p769_p3 }
  0x11   :  { %779 = shalt.err (!%p776_p7)
}
  0x12   :  { %s854_s30 = smov 128   ;;  %s855_s6 = smov 8  }
  0x13   :  { %36 = dma.hbm_to_vmem [thread:$0]  %s1079_s1, 2048, %s31_s19, [#allocation6], %s854_s30, %s854_s30, %s855_s6  }
  0x14   :  { %s780_s11 = scalar_lea.hbm %s1078_s0, 1024 }
  0x15   :  { %p781_p8 = scmp.ne.s32.totalorder %s1078_s0, %s780_s11  ;;  %p784_p9 = scmp.lt.u32.totalorder %s780_s11, %s1078_s0 }
  0x17   :  { %p786_p10 = pnand %p784_p9, %p781_p8 }
  0x19   :  { %789 = shalt.err (!%p786_p10)
}
  0x1a   :  { %s790_s16 = scalar_lea.vmem %s891_s21, 1024  ;;  %p795_p12 = scmp.lt.s32.totalorder %s891_s21, %s891_s21 }
  0x1b   :  { %p791_p11 = scmp.ne.s32.totalorder %s891_s21, %s790_s16  ;;  %p796_p13 = scmp.lt.s32.totalorder %s790_s16, %s790_s16 }
  0x1d   :  { %p797_p0 = por %p796_p13, %p795_p12 }
  0x1f   :  { %p798_p1 = pnand %p797_p0, %p791_p11 }
  0x21   :  { %801 = shalt.err (!%p798_p1)
}
  0x22   :  { %24 = dma.hbm_to_vmem [thread:$0]  %s1078_s0, 1024, %s891_s21, [#allocation3], %s854_s30, %s854_s30, %s855_s6  }
  0x23   :  { %s856_s18 = smov [#allocation7]   ;;  %s802_s23 = scalar_lea.hbm %s1081_s3, 8192 }
  0x24   :  { %s44_s19 = sshll.u32 %s856_s18, 4  ;;  %p803_p2 = scmp.ne.s32.totalorder %s1081_s3, %s802_s23  ;;  %s45_s19 = int_to_ptr.vmem [resolvable:$true] %s44_s19 }
  0x25   :  { %p806_p3 = scmp.lt.u32.totalorder %s802_s23, %s1081_s3 }
  0x27   :  { %p808_p4 = pnand %p806_p3, %p803_p2 }
  0x29   :  { %811 = shalt.err (!%p808_p4)
}
  0x2a   :  { %s812_s28 = scalar_lea.vmem %s45_s19, 8192  ;;  %p817_p6 = scmp.lt.s32.totalorder %s45_s19, %s45_s19 }
  0x2b   :  { %p813_p5 = scmp.ne.s32.totalorder %s45_s19, %s812_s28  ;;  %p818_p7 = scmp.lt.s32.totalorder %s812_s28, %s812_s28 }
  0x2d   :  { %p819_p8 = por %p818_p7, %p817_p6 }
  0x2f   :  { %p820_p9 = pnand %p819_p8, %p813_p5 }
  0x31   :  { %823 = shalt.err (!%p820_p9)
}
  0x32   :  { %s857_s0 = smov 512   ;;  %s858_s21 = smov 32  }
  0x33   :  { %50 = dma.hbm_to_vmem [thread:$0]  %s1081_s3, 8192, %s45_s19, [#allocation6], %s857_s0, %s857_s0, %s858_s21  }
  0x34   :  { %846 = dma.done.wait [#allocation3], 1024  }
  0x35   :  { %847 = vsyncadd [#allocation3], 4294966272 }
  0x36   :  { %848 = dma.done.wait [#allocation6], 10240  }
  0x37   :  { %849 = vsyncadd [#allocation6], 4294957056  ;;  %v70_v0 = vld [vmem:[#allocation5] sm:$0xff]  ;;  %v71_v1 = vld [vmem:[#allocation5 + $0x8] sm:$0xff] }
  0x38   :  { %v72_v2 = vld [vmem:[#allocation5 + $0x10] sm:$0xff]  ;;  %v637_v3 = vpack.c.bf16 %v71_v1, %v70_v0  ;;  %v73_v4 = vld [vmem:[#allocation5 + $0x18] sm:$0xff]  ;;  %v74_v6 = vld [vmem:[#allocation5 + $0x20] sm:$0xff] }
  0x39   :  { %v641_v5 = vpack.c.bf16 %v73_v4, %v72_v2  ;;  %v75_v7 = vld [vmem:[#allocation5 + $0x28] sm:$0xff]  ;;  %v62_v9 = vld [vmem:[#allocation2] sm:$0xff]  ;;  %v76_v10 = vld [vmem:[#allocation5 + $0x30] sm:$0xff] }
  0x3a   :  { %638 = vmatprep.subr.bf16.mxu0 %v637_v3  ;;  %v645_v8 = vpack.c.bf16 %v75_v7, %v74_v6  ;;  %v77_v11 = vld [vmem:[#allocation5 + $0x38] sm:$0xff]  ;;  %625 = vmatprep.mubr.f32.mxu0 %v62_v9  ;;  %v207_v12 = vld [vmem:[#allocation7 + $0x8] sm:$0xff]  ;;  %v206_v14 = vld [vmem:[#allocation7] sm:$0xff] }
  0x3b   :  { %640 = vmatpush3.bf16.msra.mxu0 %v637_v3  ;;  %v211_v13 = vld [vmem:[#allocation7 + $0x28] sm:$0xff]  ;;  %v649_v15 = vpack.c.bf16 %v77_v11, %v76_v10  ;;  %v210_v17 = vld [vmem:[#allocation7 + $0x20] sm:$0xff]  ;;  %v80_v28 = vld [vmem:[#allocation5 + $0x50] sm:$0xff] }
  0x3c   :  { %642 = vmatprep.subr.bf16.mxu0 %v641_v5  ;;  %v669_v16 = vpack.c.bf16 %v211_v13, %v207_v12  ;;  %v78_v18 = vld [vmem:[#allocation5 + $0x40] sm:$0xff]  ;;  %v79_v19 = vld [vmem:[#allocation5 + $0x48] sm:$0xff]  ;;  %v671_v20 = vpack.c.bf16 %v210_v17, %v206_v14  ;;  %v81_v31 = vld [vmem:[#allocation5 + $0x58] sm:$0xff] }
  0x3d   :  { %v215_v21 = vld [vmem:[#allocation7 + $0x48] sm:$0xff]  ;;  %v214_v23 = vld [vmem:[#allocation7 + $0x40] sm:$0xff]  ;;  %v653_v27 = vpack.c.bf16 %v79_v19, %v78_v18  ;;  %v657_v38 = vpack.c.bf16 %v81_v31, %v80_v28  ;;  %v84_v48 = vld [vmem:[#allocation5 + $0x70] sm:$0xff] }
  0x3e   :  { %670 = vmatprep.subr.bf16.mxu1 %v669_v16  ;;  %v219_v22 = vld [vmem:[#allocation7 + $0x68] sm:$0xff]  ;;  %v218_v24 = vld [vmem:[#allocation7 + $0x60] sm:$0xff]  ;;  %v85_v52 = vld [vmem:[#allocation5 + $0x78] sm:$0xff] }
  0x3f   :  { %644 = vmatpush3.bf16.msra.mxu0 %v641_v5  ;;  %672 = vmatpush1.bf16.msra.mxu1 %v671_v20  ;;  %v673_v25 = vpack.c.bf16 %v219_v22, %v215_v21  ;;  %v675_v26 = vpack.c.bf16 %v218_v24, %v214_v23  ;;  %v223_v29 = vld [vmem:[#allocation7 + $0x88] sm:$0xff]  ;;  %v222_v33 = vld [vmem:[#allocation7 + $0x80] sm:$0xff]  ;;  %v665_v56 = vpack.c.bf16 %v85_v52, %v84_v48  ;;  %v209_v57 = vld [vmem:[#allocation7 + $0x18] sm:$0xff] }
  0x40   :  { %646 = vmatprep.subr.bf16.mxu0 %v645_v8  ;;  %v227_v30 = vld [vmem:[#allocation7 + $0xa8] sm:$0xff]  ;;  %v226_v34 = vld [vmem:[#allocation7 + $0xa0] sm:$0xff]  ;;  %v213_v61 = vld [vmem:[#allocation7 + $0x38] sm:$0xff] }
  0x41   :  { %674 = vmatprep.subr.bf16.mxu1 %v673_v25  ;;  %v677_v32 = vpack.c.bf16 %v227_v30, %v223_v29  ;;  %v679_v35 = vpack.c.bf16 %v226_v34, %v222_v33  ;;  %v231_v36 = vld [vmem:[#allocation7 + $0xc8] sm:$0xff]  ;;  %v230_v40 = vld [vmem:[#allocation7 + $0xc0] sm:$0xff]  ;;  %v937_v1 = vpack.c.bf16 %v213_v61, %v209_v57  ;;  %v208_v2 = vld [vmem:[#allocation7 + $0x10] sm:$0xff] }
  0x42   :  { %v235_v37 = vld [vmem:[#allocation7 + $0xe8] sm:$0xff]  ;;  %v234_v41 = vld [vmem:[#allocation7 + $0xe0] sm:$0xff]  ;;  %v212_v3 = vld [vmem:[#allocation7 + $0x30] sm:$0xff] }
  0x43   :  { %648 = vmatpush3.bf16.msra.mxu0 %v645_v8  ;;  %676 = vmatpush1.bf16.msra.mxu1 %v675_v26  ;;  %v681_v39 = vpack.c.bf16 %v235_v37, %v231_v36  ;;  %v82_v42 = vld [vmem:[#allocation5 + $0x60] sm:$0xff]  ;;  %v83_v43 = vld [vmem:[#allocation5 + $0x68] sm:$0xff]  ;;  %v683_v46 = vpack.c.bf16 %v234_v41, %v230_v40  ;;  %v217_v4 = vld [vmem:[#allocation7 + $0x58] sm:$0xff]  ;;  %v939_v10 = vpack.c.bf16 %v212_v3, %v208_v2 }
  0x44   :  { %650 = vmatprep.subr.bf16.mxu0 %v649_v15  ;;  %678 = vmatprep.subr.bf16.mxu1 %v677_v32  ;;  %v239_v44 = vld [vmem:[#allocation7 + $0x108] sm:$0xff]  ;;  %v661_v47 = vpack.c.bf16 %v83_v43, %v82_v42  ;;  %v238_v50 = vld [vmem:[#allocation7 + $0x100] sm:$0xff]  ;;  %v221_v6 = vld [vmem:[#allocation7 + $0x78] sm:$0xff] }
  0x45   :  { %v243_v45 = vld [vmem:[#allocation7 + $0x128] sm:$0xff]  ;;  %v242_v51 = vld [vmem:[#allocation7 + $0x120] sm:$0xff]  ;;  %v64_v11 = vld [vmem:[#allocation2 + $0x10] sm:$0xff]  ;;  %v942_v12 = vpack.c.bf16 %v221_v6, %v217_v4 }
  0x46   :  { %v685_v49 = vpack.c.bf16 %v243_v45, %v239_v44  ;;  %v247_v53 = vld [vmem:[#allocation7 + $0x148] sm:$0xff]  ;;  %v687_v55 = vpack.c.bf16 %v242_v51, %v238_v50  ;;  %v246_v59 = vld [vmem:[#allocation7 + $0x140] sm:$0xff]  ;;  %v216_v13 = vld [vmem:[#allocation7 + $0x50] sm:$0xff] }
  0x47   :  { %652 = vmatpush3.bf16.msra.mxu0 %v649_v15  ;;  %680 = vmatpush1.bf16.msra.mxu1 %v679_v35  ;;  %v251_v54 = vld [vmem:[#allocation7 + $0x168] sm:$0xff]  ;;  %v250_v60 = vld [vmem:[#allocation7 + $0x160] sm:$0xff]  ;;  %v220_v14 = vld [vmem:[#allocation7 + $0x70] sm:$0xff] }
  0x48   :  { %654 = vmatprep.subr.bf16.mxu0 %v653_v27  ;;  %682 = vmatprep.subr.bf16.mxu1 %v681_v39  ;;  %v689_v58 = vpack.c.bf16 %v251_v54, %v247_v53  ;;  %v255_v62 = vld [vmem:[#allocation7 + $0x188] sm:$0xff]  ;;  %v691_v0 = vpack.c.bf16 %v250_v60, %v246_v59  ;;  %v254_v7 = vld [vmem:[#allocation7 + $0x180] sm:$0xff]  ;;  %v225_v16 = vld [vmem:[#allocation7 + $0x98] sm:$0xff]  ;;  %v945_v19 = vpack.c.bf16 %v220_v14, %v216_v13 }
  0x49   :  { %v259_v63 = vld [vmem:[#allocation7 + $0x1a8] sm:$0xff]  ;;  %v258_v8 = vld [vmem:[#allocation7 + $0x1a0] sm:$0xff]  ;;  %v229_v17 = vld [vmem:[#allocation7 + $0xb8] sm:$0xff] }
  0x4a   :  { %v693_v5 = vpack.c.bf16 %v259_v63, %v255_v62  ;;  %v63_v9 = vld [vmem:[#allocation2 + $0x8] sm:$0xff]  ;;  %v695_v15 = vpack.c.bf16 %v258_v8, %v254_v7  ;;  %v65_v18 = vld [vmem:[#allocation2 + $0x18] sm:$0xff]  ;;  %v66_v20 = vld [vmem:[#allocation2 + $0x20] sm:$0xff]  ;;  %v948_v21 = vpack.c.bf16 %v229_v17, %v225_v16 }
  0x4b   :  { %656 = vmatpush3.bf16.msra.mxu0 %v653_v27  ;;  %684 = vmatpush1.bf16.msra.mxu1 %v683_v46  ;;  %v224_v22 = vld [vmem:[#allocation7 + $0x90] sm:$0xff]  ;;  %v233_v24 = vld [vmem:[#allocation7 + $0xd8] sm:$0xff]  ;;  %v67_v26 = vld [vmem:[#allocation2 + $0x28] sm:$0xff] }
  0x4c   :  { %658 = vmatprep.subr.bf16.mxu0 %v657_v38  ;;  %686 = vmatprep.subr.bf16.mxu1 %v685_v49  ;;  %v228_v23 = vld [vmem:[#allocation7 + $0xb0] sm:$0xff]  ;;  %v237_v25 = vld [vmem:[#allocation7 + $0xf8] sm:$0xff]  ;;  %v263_v52 = vld [vmem:[#allocation7 + $0x1c8] sm:$0xff] }
  0x4d   :  { %v951_v27 = vpack.c.bf16 %v228_v23, %v224_v22  ;;  %v68_v28 = vld [vmem:[#allocation2 + $0x30] sm:$0xff]  ;;  %v954_v29 = vpack.c.bf16 %v237_v25, %v233_v24  ;;  %v241_v32 = vld [vmem:[#allocation7 + $0x118] sm:$0xff]  ;;  %v267_v53 = vld [vmem:[#allocation7 + $0x1e8] sm:$0xff] }
  0x4e   :  { %v232_v30 = vld [vmem:[#allocation7 + $0xd0] sm:$0xff]  ;;  %v245_v33 = vld [vmem:[#allocation7 + $0x138] sm:$0xff]  ;;  %v266_v57 = vld [vmem:[#allocation7 + $0x1e0] sm:$0xff] }
  0x4f   :  { %660 = vmatpush3.bf16.msra.mxu0 %v657_v38  ;;  %688 = vmatpush1.bf16.msra.mxu1 %v687_v55  ;;  %v236_v31 = vld [vmem:[#allocation7 + $0xf0] sm:$0xff]  ;;  %v69_v34 = vld [vmem:[#allocation2 + $0x38] sm:$0xff]  ;;  %v960_v36 = vpack.c.bf16 %v245_v33, %v241_v32  ;;  %v697_v55 = vpack.c.bf16 %v267_v53, %v263_v52  ;;  %v568_v2 = vld [vmem:[%s1080_s2] ss:$0 sm:$0xff] }
  0x50   :  { %662 = vmatprep.subr.bf16.mxu0 %v661_v47  ;;  %690 = vmatprep.subr.bf16.mxu1 %v689_v58  ;;  %v957_v35 = vpack.c.bf16 %v236_v31, %v232_v30  ;;  %v240_v37 = vld [vmem:[#allocation7 + $0x110] sm:$0xff]  ;;  %v249_v39 = vld [vmem:[#allocation7 + $0x158] sm:$0xff]  ;;  %v270_v30 = vld [vmem:[%s1082_s4] sm:$0xf]  ;;  %s860_s4 = smov [#allocation8]  }
  0x51   :  { %v244_v38 = vld [vmem:[#allocation7 + $0x130] sm:$0xff]  ;;  %v253_v40 = vld [vmem:[#allocation7 + $0x178] sm:$0xff]  ;;  %s555_s8 = sshll.u32 %s860_s4, 4  ;;  %s556_s8 = int_to_ptr.vmem [resolvable:$true] %s555_s8 }
  0x52   :  { %v963_v41 = vpack.c.bf16 %v244_v38, %v240_v37  ;;  %v966_v42 = vpack.c.bf16 %v253_v40, %v249_v39  ;;  %v248_v43 = vld [vmem:[#allocation7 + $0x150] sm:$0xff]  ;;  %v257_v45 = vld [vmem:[#allocation7 + $0x198] sm:$0xff]  ;;  %s824_s9 = scalar_lea.vmem %s556_s8, 4096  ;;  %p829_p11 = scmp.lt.s32.totalorder %s556_s8, %s556_s8 }
  0x53   :  { %664 = vmatpush3.bf16.msra.mxu0 %v661_v47  ;;  %692 = vmatpush1.bf16.msra.mxu1 %v691_v0  ;;  %v252_v44 = vld [vmem:[#allocation7 + $0x170] sm:$0xff]  ;;  %v261_v46 = vld [vmem:[#allocation7 + $0x1b8] sm:$0xff]  ;;  %v859_v0 = vmov 0.0   ;;  %p825_p10 = scmp.ne.s32.totalorder %s556_s8, %s824_s9  ;;  %p830_p12 = scmp.lt.s32.totalorder %s824_s9, %s824_s9 }
  0x54   :  { %666 = vmatprep.subr.bf16.mxu0 %v665_v56  ;;  %694 = vmatprep.subr.bf16.mxu1 %v693_v5  ;;  %v969_v47 = vpack.c.bf16 %v252_v44, %v248_v43  ;;  %v972_v48 = vpack.c.bf16 %v261_v46, %v257_v45  ;;  %v256_v49 = vld [vmem:[#allocation7 + $0x190] sm:$0xff]  ;;  %v265_v54 = vld [vmem:[#allocation7 + $0x1d8] sm:$0xff] }
  0x55   :  { %v260_v50 = vld [vmem:[#allocation7 + $0x1b0] sm:$0xff]  ;;  %v269_v59 = vld [vmem:[#allocation7 + $0x1f8] sm:$0xff]  ;;  %356 = vmatprep.mubr.f32.mxu1 %v859_v0  ;;  %p831_p13 = por %p830_p12, %p829_p11 }
  0x56   :  { %v975_v51 = vpack.c.bf16 %v260_v50, %v256_v49  ;;  %v264_v60 = vld [vmem:[#allocation7 + $0x1d0] sm:$0xff]  ;;  %v979_v62 = vpack.c.bf16 %v269_v59, %v265_v54 }
  0x57   :  { %668 = vmatpush3.bf16.msra.mxu0 %v665_v56  ;;  %696 = vmatpush1.bf16.msra.mxu1 %v695_v15  ;;  %v262_v56 = vld [vmem:[#allocation7 + $0x1c0] sm:$0xff]  ;;  %v268_v61 = vld [vmem:[#allocation7 + $0x1f0] sm:$0xff]  ;;  %p832_p0 = pnand %p831_p13, %p825_p10 }
  0x58   :  { %702 = vmatprep.subr.bf16.mxu0 %v937_v1  ;;  %v699_v58 = vpack.c.bf16 %v266_v57, %v262_v56  ;;  %698 = vmatprep.subr.bf16.mxu1 %v697_v55  ;;  %v981_v63 = vpack.c.bf16 %v268_v61, %v264_v60 }
  0x5a   :  { %626 = vmatmul.mubr.f32.vlgmr.msra.gmra.mrb[0].mxu0 %v63_v9 }
  0x5b   :  { %628 = vmatprep.mubr.f32.mxu0 %v64_v11  ;;  %704 = vmatpush1.bf16.msra.mxu0 %v939_v10 }
  0x5c   :  { %706 = vmatprep.subr.bf16.mxu0 %v942_v12  ;;  %700 = vmatpush1.bf16.msra.mxu1 %v699_v58 }
  0x5d   :  { %733 = vmatprep.subr.bf16.mxu1 %v937_v1 }
  0x5e   :  { %629 = vmatmul.mubr.f32.gmra.mrb[2].mxu0 %v65_v18 }
  0x5f   :  { %631 = vmatprep.mubr.f32.mxu0 %v66_v20  ;;  %708 = vmatpush1.bf16.msra.mxu0 %v945_v19 }
  0x60   :  { %710 = vmatprep.subr.bf16.mxu0 %v948_v21 }
  0x62   :  { %632 = vmatmul.mubr.f32.gmra.mrb[4].mxu0 %v67_v26  ;;  %v272_v26 = vlaneseq }
  0x63   :  { %634 = vmatprep.mubr.f32.mxu0 %v68_v28  ;;  %712 = vmatpush1.bf16.msra.mxu0 %v951_v27 }
  0x64   :  { %714 = vmatprep.subr.bf16.mxu0 %v954_v29 }
  0x66   :  { %635 = vmatmul.mubr.f32.gmra.mrb[6].mxu0 %v69_v34 }
  0x67   :  { %716 = vmatpush1.bf16.msra.mxu0 %v957_v35  ;;  %469 = vmatprep.mubr.f32.mxu0 %v859_v0 }
  0x68   :  { %718 = vmatprep.subr.bf16.mxu0 %v960_v36 }
  0x6b   :  { %720 = vmatpush1.bf16.msra.mxu0 %v963_v41 }
  0x6c   :  { %722 = vmatprep.subr.bf16.mxu0 %v966_v42 }
  0x6f   :  { %724 = vmatpush1.bf16.msra.mxu0 %v969_v47 }
  0x70   :  { %726 = vmatprep.subr.bf16.mxu0 %v972_v48 }
  0x73   :  { %728 = vmatpush1.bf16.msra.mxu0 %v975_v51 }
  0x74   :  { %730 = vmatprep.subr.bf16.mxu0 %v979_v62 }
  0x77   :  { %732 = vmatpush1.bf16.msra.mxu0 %v981_v63 }
 0x12d   :  { %v627_v3 = vpop.f32.mrb[0].mxu0 }
 0x12e   :  { %v159_v4 = vpop.f32.mrb[1].mxu0  ;;  %v165_v6 = vadd.f32 %v627_v3, %v568_v2 }
 0x12f   :  { %v160_v5 = vadd.f32 %v568_v2, %v159_v4 }
 0x130   :  { %v199_v11 = vmax.f32 %v165_v6, 0.0 }
 0x131   :  { %v198_v7 = vmax.f32 %v160_v5, 0.0  ;;  %v630_v8 = vpop.f32.mrb[2].mxu0 }
 0x132   :  { %v169_v9 = vpop.f32.mrb[3].mxu0  ;;  %v175_v16 = vadd.f32 %v630_v8, %v568_v2 }
 0x133   :  { %357 = vmatmul.mubr.f32.vlgmr.msra.gmra.mrb[0].mxu1 %v198_v7  ;;  %470 = vmatmul.mubr.f32.vlgmr.msra.gmra.mrb[8].mxu0 %v198_v7  ;;  %v170_v1 = vadd.f32 %v568_v2, %v169_v9 }
 0x134   :  { %741 = vmatpush1.bf16.msra.mxu1 %v939_v10  ;;  %362 = vmatprep.mubr.f32.mxu1 %v859_v0  ;;  %v201_v18 = vmax.f32 %v175_v16, 0.0 }
 0x135   :  { %734 = vmatprep.subr.bf16.mxu1 %v942_v12  ;;  %475 = vmatprep.mubr.f32.mxu0 %v859_v0  ;;  %v633_v13 = vpop.f32.mrb[4].mxu0  ;;  %v200_v15 = vmax.f32 %v170_v1, 0.0 }
 0x136   :  { %v179_v14 = vpop.f32.mrb[5].mxu0  ;;  %v185_v20 = vadd.f32 %v633_v13, %v568_v2 }
 0x137   :  { %363 = vmatmul.mubr.f32.gmra.mrb[2].mxu1 %v199_v11  ;;  %476 = vmatmul.mubr.f32.gmra.mrb[10].mxu0 %v199_v11  ;;  %v180_v12 = vadd.f32 %v568_v2, %v179_v14 }
 0x138   :  { %742 = vmatpush1.bf16.msra.mxu1 %v945_v19  ;;  %368 = vmatprep.mubr.f32.mxu1 %v859_v0  ;;  %v203_v22 = vmax.f32 %v185_v20, 0.0 }
 0x139   :  { %735 = vmatprep.subr.bf16.mxu1 %v948_v21  ;;  %481 = vmatprep.mubr.f32.mxu0 %v859_v0  ;;  %v636_v10 = vpop.f32.mrb[6].mxu0  ;;  %v202_v19 = vmax.f32 %v180_v12, 0.0 }
 0x13a   :  { %v189_v17 = vpop.f32.mrb[7].mxu0  ;;  %v195_v24 = vadd.f32 %v636_v10, %v568_v2 }
 0x13b   :  { %369 = vmatmul.mubr.f32.gmra.mrb[4].mxu1 %v200_v15  ;;  %482 = vmatmul.mubr.f32.gmra.mrb[12].mxu0 %v200_v15  ;;  %v190_v21 = vadd.f32 %v568_v2, %v189_v17 }
 0x13c   :  { %743 = vmatpush1.bf16.msra.mxu1 %v951_v27  ;;  %374 = vmatprep.mubr.f32.mxu1 %v859_v0  ;;  %v205_v25 = vmax.f32 %v195_v24, 0.0  ;;  %v273_v27 = vshrl.u32 %v272_v26, 7 }
 0x13d   :  { %736 = vmatprep.subr.bf16.mxu1 %v954_v29  ;;  %487 = vmatprep.mubr.f32.mxu0 %v859_v0  ;;  %v204_v23 = vmax.f32 %v190_v21, 0.0 }
 0x13e   :  { %v274_v28 = vsub.s32 0, %v273_v27  ;;  %v282_v29 = vsub.s32 2, %v273_v27  ;;  %v278_v31 = vsub.s32 1, %v273_v27  ;;  %v286_v32 = vsub.s32 3, %v273_v27 }
 0x13f   :  { %375 = vmatmul.mubr.f32.gmra.mrb[6].mxu1 %v201_v18  ;;  %488 = vmatmul.mubr.f32.gmra.mrb[14].mxu0 %v201_v18 }
 0x140   :  { %744 = vmatpush1.bf16.msra.mxu1 %v957_v35  ;;  %380 = vmatprep.mubr.f32.mxu1 %v859_v0  ;;  %v1023_v33 = vrot.slane %v270_v30, %v274_v28  ;;  %v1025_v34 = vrot.slane %v270_v30, %v282_v29  ;;  %v1027_v35 = vrot.slane %v270_v30, %v278_v31 }
 0x141   :  { %737 = vmatprep.subr.bf16.mxu1 %v960_v36  ;;  %v1029_v36 = vrot.slane %v270_v30, %v286_v32 }
 0x143   :  { %381 = vmatmul.mubr.f32.gmra.mrb[8].mxu1 %v202_v19 }
 0x144   :  { %745 = vmatpush1.bf16.msra.mxu1 %v963_v41  ;;  %386 = vmatprep.mubr.f32.mxu1 %v859_v0 }
 0x145   :  { %738 = vmatprep.subr.bf16.mxu1 %v966_v42 }
 0x147   :  { %387 = vmatmul.mubr.f32.gmra.mrb[10].mxu1 %v203_v22 }
 0x148   :  { %746 = vmatpush1.bf16.msra.mxu1 %v969_v47  ;;  %392 = vmatprep.mubr.f32.mxu1 %v859_v0 }
 0x149   :  { %739 = vmatprep.subr.bf16.mxu1 %v972_v48 }
 0x14b   :  { %393 = vmatmul.mubr.f32.gmra.mrb[12].mxu1 %v204_v23 }
 0x14c   :  { %747 = vmatpush1.bf16.msra.mxu1 %v975_v51  ;;  %398 = vmatprep.mubr.f32.mxu1 %v859_v0 }
 0x14d   :  { %740 = vmatprep.subr.bf16.mxu1 %v979_v62 }
 0x14f   :  { %399 = vmatmul.mubr.f32.gmra.mrb[14].mxu1 %v205_v25 }
 0x150   :  { %748 = vmatpush1.bf16.msra.mxu1 %v981_v63  ;;  %493 = vmatprep.mubr.f32.mxu1 %v859_v0 }
 0x153   :  { %494 = vmatmul.mubr.f32.vlgmr.msra.gmra.mrb[16].mxu1 %v202_v19 }
 0x154   :  { %499 = vmatprep.mubr.f32.mxu1 %v859_v0 }
 0x157   :  { %500 = vmatmul.mubr.f32.gmra.mrb[18].mxu1 %v203_v22 }
 0x158   :  { %505 = vmatprep.mubr.f32.mxu1 %v859_v0 }
 0x15b   :  { %506 = vmatmul.mubr.f32.gmra.mrb[20].mxu1 %v204_v23 }
 0x15c   :  { %511 = vmatprep.mubr.f32.mxu1 %v859_v0 }
 0x15f   :  { %512 = vmatmul.mubr.f32.gmra.mrb[22].mxu1 %v205_v25 }
 0x206   :  { %v358_v37 = vpop.f32.mrb[0].mxu1  ;;  %v471_v38 = vpop.f32.mrb[8].mxu0 }
 0x207   :  { %v359_v39 = vadd.f32 %v358_v37, %v1023_v33  ;;  %v472_v40 = vadd.f32 %v471_v38, %v1025_v34  ;;  %v360_v41 = vpop.f32.mrb[1].mxu1  ;;  %v473_v42 = vpop.f32.mrb[9].mxu0 }
 0x208   :  { %v361_v43 = vadd.f32 %v360_v41, %v1027_v35  ;;  %v474_v44 = vadd.f32 %v473_v42, %v1029_v36 }
 0x209   :  { %518 = vst [vmem:[#allocation8] sm:$0xff] %v359_v39  ;;  %520 = vst [vmem:[#allocation8 + $0x10] sm:$0xff] %v472_v40 }
 0x20a   :  { %519 = vst [vmem:[#allocation8 + $0x8] sm:$0xff] %v361_v43  ;;  %521 = vst [vmem:[#allocation8 + $0x18] sm:$0xff] %v474_v44  ;;  %v364_v45 = vpop.f32.mrb[2].mxu1  ;;  %v477_v46 = vpop.f32.mrb[10].mxu0 }
 0x20b   :  { %v365_v47 = vadd.f32 %v364_v45, %v1023_v33  ;;  %v478_v48 = vadd.f32 %v477_v46, %v1025_v34  ;;  %v366_v49 = vpop.f32.mrb[3].mxu1  ;;  %v479_v50 = vpop.f32.mrb[11].mxu0 }
 0x20c   :  { %v367_v51 = vadd.f32 %v366_v49, %v1027_v35  ;;  %v480_v52 = vadd.f32 %v479_v50, %v1029_v36 }
 0x20d   :  { %522 = vst [vmem:[#allocation8 + $0x20] sm:$0xff] %v365_v47  ;;  %524 = vst [vmem:[#allocation8 + $0x30] sm:$0xff] %v478_v48 }
 0x20e   :  { %523 = vst [vmem:[#allocation8 + $0x28] sm:$0xff] %v367_v51  ;;  %525 = vst [vmem:[#allocation8 + $0x38] sm:$0xff] %v480_v52  ;;  %v370_v53 = vpop.f32.mrb[4].mxu1  ;;  %v483_v54 = vpop.f32.mrb[12].mxu0 }
 0x20f   :  { %v371_v55 = vadd.f32 %v370_v53, %v1023_v33  ;;  %v484_v56 = vadd.f32 %v483_v54, %v1025_v34  ;;  %v372_v57 = vpop.f32.mrb[5].mxu1  ;;  %v485_v58 = vpop.f32.mrb[13].mxu0 }
 0x210   :  { %v373_v59 = vadd.f32 %v372_v57, %v1027_v35  ;;  %v486_v60 = vadd.f32 %v485_v58, %v1029_v36 }
 0x211   :  { %526 = vst [vmem:[#allocation8 + $0x40] sm:$0xff] %v371_v55  ;;  %528 = vst [vmem:[#allocation8 + $0x50] sm:$0xff] %v484_v56 }
 0x212   :  { %527 = vst [vmem:[#allocation8 + $0x48] sm:$0xff] %v373_v59  ;;  %529 = vst [vmem:[#allocation8 + $0x58] sm:$0xff] %v486_v60  ;;  %v376_v61 = vpop.f32.mrb[6].mxu1  ;;  %v489_v62 = vpop.f32.mrb[14].mxu0 }
 0x213   :  { %v377_v63 = vadd.f32 %v376_v61, %v1023_v33  ;;  %v490_v0 = vadd.f32 %v489_v62, %v1025_v34  ;;  %v378_v2 = vpop.f32.mrb[7].mxu1  ;;  %v491_v3 = vpop.f32.mrb[15].mxu0 }
 0x214   :  { %v379_v4 = vadd.f32 %v378_v2, %v1027_v35  ;;  %v492_v5 = vadd.f32 %v491_v3, %v1029_v36 }
 0x215   :  { %530 = vst [vmem:[#allocation8 + $0x60] sm:$0xff] %v377_v63  ;;  %532 = vst [vmem:[#allocation8 + $0x70] sm:$0xff] %v490_v0 }
 0x216   :  { %531 = vst [vmem:[#allocation8 + $0x68] sm:$0xff] %v379_v4  ;;  %533 = vst [vmem:[#allocation8 + $0x78] sm:$0xff] %v492_v5  ;;  %v382_v6 = vpop.f32.mrb[8].mxu1 }
 0x217   :  { %v383_v7 = vadd.f32 %v382_v6, %v1023_v33  ;;  %v384_v8 = vpop.f32.mrb[9].mxu1 }
 0x218   :  { %v385_v9 = vadd.f32 %v384_v8, %v1027_v35 }
 0x219   :  { %534 = vst [vmem:[#allocation8 + $0x80] sm:$0xff] %v383_v7 }
 0x21a   :  { %535 = vst [vmem:[#allocation8 + $0x88] sm:$0xff] %v385_v9  ;;  %v388_v1 = vpop.f32.mrb[10].mxu1 }
 0x21b   :  { %v389_v11 = vadd.f32 %v388_v1, %v1023_v33  ;;  %v390_v13 = vpop.f32.mrb[11].mxu1 }
 0x21c   :  { %v391_v14 = vadd.f32 %v390_v13, %v1027_v35 }
 0x21d   :  { %538 = vst [vmem:[#allocation8 + $0xa0] sm:$0xff] %v389_v11 }
 0x21e   :  { %539 = vst [vmem:[#allocation8 + $0xa8] sm:$0xff] %v391_v14  ;;  %v394_v15 = vpop.f32.mrb[12].mxu1 }
 0x21f   :  { %v395_v16 = vadd.f32 %v394_v15, %v1023_v33  ;;  %v396_v10 = vpop.f32.mrb[13].mxu1 }
 0x220   :  { %v397_v17 = vadd.f32 %v396_v10, %v1027_v35 }
 0x221   :  { %542 = vst [vmem:[#allocation8 + $0xc0] sm:$0xff] %v395_v16 }
 0x222   :  { %543 = vst [vmem:[#allocation8 + $0xc8] sm:$0xff] %v397_v17  ;;  %v400_v12 = vpop.f32.mrb[14].mxu1 }
 0x223   :  { %v401_v18 = vadd.f32 %v400_v12, %v1023_v33  ;;  %v402_v19 = vpop.f32.mrb[15].mxu1 }
 0x224   :  { %v403_v20 = vadd.f32 %v402_v19, %v1027_v35 }
 0x225   :  { %546 = vst [vmem:[#allocation8 + $0xe0] sm:$0xff] %v401_v18 }
 0x226   :  { %547 = vst [vmem:[#allocation8 + $0xe8] sm:$0xff] %v403_v20  ;;  %v495_v21 = vpop.f32.mrb[16].mxu1 }
 0x227   :  { %v496_v22 = vadd.f32 %v495_v21, %v1025_v34  ;;  %v497_v23 = vpop.f32.mrb[17].mxu1 }
 0x228   :  { %v498_v24 = vadd.f32 %v497_v23, %v1029_v36 }
 0x229   :  { %536 = vst [vmem:[#allocation8 + $0x90] sm:$0xff] %v496_v22 }
 0x22a   :  { %537 = vst [vmem:[#allocation8 + $0x98] sm:$0xff] %v498_v24  ;;  %v501_v25 = vpop.f32.mrb[18].mxu1 }
 0x22b   :  { %v502_v26 = vadd.f32 %v501_v25, %v1025_v34  ;;  %v503_v27 = vpop.f32.mrb[19].mxu1 }
 0x22c   :  { %v504_v28 = vadd.f32 %v503_v27, %v1029_v36 }
 0x22d   :  { %540 = vst [vmem:[#allocation8 + $0xb0] sm:$0xff] %v502_v26 }
 0x22e   :  { %541 = vst [vmem:[#allocation8 + $0xb8] sm:$0xff] %v504_v28  ;;  %v507_v29 = vpop.f32.mrb[20].mxu1 }
 0x22f   :  { %v508_v30 = vadd.f32 %v507_v29, %v1025_v34  ;;  %v509_v31 = vpop.f32.mrb[21].mxu1 }
 0x230   :  { %v510_v32 = vadd.f32 %v509_v31, %v1029_v36 }
 0x231   :  { %544 = vst [vmem:[#allocation8 + $0xd0] sm:$0xff] %v508_v30 }
 0x232   :  { %545 = vst [vmem:[#allocation8 + $0xd8] sm:$0xff] %v510_v32  ;;  %v513_v33 = vpop.f32.mrb[22].mxu1 }
 0x233   :  { %v514_v35 = vadd.f32 %v513_v33, %v1025_v34  ;;  %v515_v37 = vpop.f32.mrb[23].mxu1 }
 0x234   :  { %v516_v38 = vadd.f32 %v515_v37, %v1029_v36 }
 0x235   :  { %548 = vst [vmem:[#allocation8 + $0xf0] sm:$0xff] %v514_v35 }
 0x236   :  { %549 = vst [vmem:[#allocation8 + $0xf8] sm:$0xff] %v516_v38 }
 0x237   :  { %835 = shalt.err (!%p832_p0)
}
 0x238   :  { %s836_s12 = scalar_lea.hbm %s1083_s5, 4096 }
 0x239   :  { %p837_p1 = scmp.ne.s32.totalorder %s1083_s5, %s836_s12  ;;  %p840_p2 = scmp.lt.u32.totalorder %s836_s12, %s1083_s5 }
 0x23b   :  { %p842_p3 = pnand %p840_p2, %p837_p1 }
 0x23d   :  { %845 = shalt.err (!%p842_p3)
}
 0x23e   :  { %561 = dma.vmem_to_hbm [thread:$0]  %s556_s8, 4096, %s1083_s5, [#allocation4], %s857_s0, %s857_s0, %s858_s21  }
 0x23f   :  { %850 = dma.done.wait [#allocation4], 4096  }
 0x240   :  { %851 = vsyncadd [#allocation4], 4294963200 }
 0x241   :  { %565 = vsyncpa [#allocation3], 1 }
 0x242   :  { %566 = vsyncpa [#allocation6], 1 }
 0x243   :  { %567 = vsyncpa [#allocation4], 1 }

</bundles_post_ra>
